<compile_context>
chip_gen: v7x
topology: tpu7x:2x2x1
jax: 0.10.0
libtpu: 0.0.40
codegen_flags: <defaults>
</compile_context>

<pallas_src>
import functools
import math

import jax
import jax.numpy as jnp
from jax import lax
from jax.experimental import pallas as pl
from jax.experimental.pallas import tpu as pltpu

_NORM_EPS = 1e-12  # matches F.normalize default eps


def _l2_normalize(x):
    # x / max(||x||_2, eps)  ==  x * rsqrt(max(sum(x^2), eps^2))
    sumsq = jnp.sum(x * x, axis=-1, keepdims=True)
    return x * lax.rsqrt(jnp.maximum(sumsq, _NORM_EPS * _NORM_EPS))


def _cosine_tile(f_ref, w_ref):
    """(TB, D) x (TC, D) -> (TB, TC): contract D directly, f32 MXU accumulate."""
    return lax.dot_general(
        f_ref[...],
        w_ref[...],
        dimension_numbers=(((1,), (1,)), ((), ())),
        preferred_element_type=jnp.float32,
    )


def _arcface_train_kernel(f_ref, w_ref, lab_ref, o_ref, *, s, cos_m, sin_m):
    cosine = _cosine_tile(f_ref, w_ref)            # (TB, TC) f32
    labels = lab_ref[...]                          # (TB, 1) int32

    # Global class index of each column of this tile (class axis = grid axis 0).
    tile_c = o_ref.shape[1]
    col0 = pl.program_id(0) * tile_c
    class_idx = col0 + lax.broadcasted_iota(jnp.int32, cosine.shape, 1)
    is_label = class_idx == labels                 # (TB, TC) bool

    # Margin math only at the label column of each row. If the label is not in
    # this class tile the mask is all-false and phi is never selected.
    cos_t = jnp.sum(jnp.where(is_label, cosine, 0.0), axis=-1, keepdims=True)
    sin_t = jnp.sqrt(jnp.maximum(1.0 - cos_t * cos_t, 0.0))  # clamp: NaN-safe
    phi_t = cos_t * cos_m - sin_t * sin_m          # (TB, 1)

    o_ref[...] = (jnp.where(is_label, phi_t, cosine) * s).astype(o_ref.dtype)


def _arcface_infer_kernel(f_ref, w_ref, o_ref, *, s):
    o_ref[...] = (_cosine_tile(f_ref, w_ref) * s).astype(o_ref.dtype)


def _choose_tiles(B, Cp, D, cs):
    """Pick (tb, tc). Cp is already a multiple of 128; cs = compute itemsize."""
    # Class tile: lane-dense multiple of 128, capped so one weight tile <= ~8 MiB.
    tc_cap = max(128, ((8 << 20) // max(1, D * cs)) // 128 * 128)
    tc = min(Cp, 2048, tc_cap)
    # Batch tile: keep the whole batch resident when it is cheap, else 256
    # (full MXU tiles on v6e/v7x, multiple of 128 for v5e).
    tb = B if B * D * cs <= (4 << 20) else min(256, B)
    return tb, tc


def _compiler_params(tb, tc, d, cs, out_itemsize):
    # Double-buffered tiles + the f32 cosine/select temporaries the body
    # materializes, plus headroom; capped at 48 MiB so v7x (64 MiB physical
    # VMEM) keeps room for Mosaic internal scratch.
    need = (2 * (tc * d * cs)                # weight tile
            + 2 * (tb * d * cs)              # feature tile
            + 2 * (tb * 128 * 4)             # labels tile, lane-padded
            + 2 * (tb * tc * out_itemsize)   # output tile
            + 3 * (tb * tc * 4))             # f32 cosine + mask/select temps
    vmem = int(min(48 << 20, max(need + (8 << 20), 32 << 20)))
    return pltpu.CompilerParams(
        dimension_semantics=("parallel", "parallel"),
        vmem_limit_bytes=vmem,
    )


def arc_margin_product(features, weight, labels=None, *, s=30.0, m=0.5,
                       block_b=None, block_c=None,
                       compute_dtype=jnp.bfloat16, out_dtype=jnp.float32):
    """ArcFace forward. features: (B, D), weight: (C, D), labels: optional (B,).
    Returns (B, C) logits in `out_dtype` (default f32; pass bf16 to halve the
    output HBM stream when the consumer is bf16)."""
    B, D = features.shape
    C, D2 = weight.shape
    assert D == D2

    cs = jnp.dtype(compute_dtype).itemsize
    out_is = jnp.dtype(out_dtype).itemsize

    # Hoist normalization out of the kernel; stream narrow operands.
    f_n = _l2_normalize(features.astype(jnp.float32)).astype(compute_dtype)
    w_n = _l2_normalize(weight.astype(jnp.float32)).astype(compute_dtype)

    # Pad the class axis to a multiple of 128 for lane-dense output stores.
    c_pad = (-C) % 128
    if c_pad:
        w_n = jnp.pad(w_n, ((0, c_pad), (0, 0)))
    Cp = C + c_pad

    tb, tc = _choose_tiles(B, Cp, D, cs)
    if block_b is not None:
        tb = block_b
    if block_c is not None:
        tc = block_c

    # Class tiles outer, batch tiles inner: each weight tile is fetched from
    # HBM exactly once (its block index is constant along the inner axis).
    grid = (pl.cdiv(Cp, tc), pl.cdiv(B, tb))

    f_spec = pl.BlockSpec((tb, D), lambda c, b: (b, 0))
    w_spec = pl.BlockSpec((tc, D), lambda c, b: (c, 0))   # resident across inner axis
    o_spec = pl.BlockSpec((tb, tc), lambda c, b: (b, c))  # lane-dense (tc % 128 == 0)

    params = _compiler_params(tb, tc, D, cs, out_is)
    cost = pl.CostEstimate(
        flops=2 * B * Cp * D,
        transcendentals=B,
        bytes_accessed=int((B * D + Cp * D) * cs + B * Cp * out_is + B * 4),
    )
    out_shape = jax.ShapeDtypeStruct((B, Cp), out_dtype)

    if labels is None:
        out = pl.pallas_call(
            functools.partial(_arcface_infer_kernel, s=s),
            out_shape=out_shape,
            grid=grid,
            in_specs=[f_spec, w_spec],
            out_specs=o_spec,
            compiler_params=params,
            cost_estimate=cost,
        )(f_n, w_n)
    else:
        labels2d = labels.reshape(B, 1).astype(jnp.int32)
        lab_spec = pl.BlockSpec((tb, 1), lambda c, b: (b, 0))
        out = pl.pallas_call(
            functools.partial(_arcface_train_kernel, s=s,
                              cos_m=math.cos(m), sin_m=math.sin(m)),
            out_shape=out_shape,
            grid=grid,
            in_specs=[f_spec, w_spec, lab_spec],
            out_specs=o_spec,
            compiler_params=params,
            cost_estimate=cost,
        )(f_n, w_n, labels2d)

    return out[:, :C] if c_pad else out


def xavier_uniform(key, out_features, in_features):
    # nn.init.xavier_uniform_ on a (out, in) matrix.
    bound = math.sqrt(6.0 / (in_features + out_features))
    return jax.random.uniform(key, (out_features, in_features),
                              dtype=jnp.float32, minval=-bound, maxval=bound)


if __name__ == "__main__":
    B, IN_FEAT, OUT_FEAT = 16, 32, 256
    S, M = 30.0, 0.5

    key = jax.random.PRNGKey(0)
    k_feat, k_w, k_lab = jax.random.split(key, 3)

    features = jax.random.normal(k_feat, (B, IN_FEAT), dtype=jnp.float32)
    weight = xavier_uniform(k_w, OUT_FEAT, IN_FEAT)
    labels = jax.random.randint(k_lab, (B,), 0, OUT_FEAT, dtype=jnp.int32)

    # Force class tiling (grid = (2, 1)) even at these small demo shapes.
    logits_train = arc_margin_product(features, weight, labels, s=S, m=M,
                                      block_c=128)
    logits_train = jax.block_until_ready(logits_train)

    logits_infer = arc_margin_product(features, weight, None, s=S, m=M,
                                      block_c=128)
    logits_infer = jax.block_until_ready(logits_infer)

    # Pure-JAX reference mirroring the kernel's compute path (pre-normalized
    # bf16 operands, f32 accumulation).
    def ref(f, w, lab):
        fn = _l2_normalize(f.astype(jnp.float32)).astype(jnp.bfloat16)
        wn = _l2_normalize(w.astype(jnp.float32)).astype(jnp.bfloat16)
        cos = jnp.dot(fn, wn.T, preferred_element_type=jnp.float32)
        if lab is None:
            return cos * S
        sin = jnp.sqrt(jnp.maximum(1.0 - cos * cos, 0.0))
        phi = cos * math.cos(M) - sin * math.sin(M)
        oh = jax.nn.one_hot(lab, cos.shape[1], dtype=jnp.float32)
        return jnp.where(oh > 0, phi, cos) * S

    assert jnp.allclose(logits_train, ref(features, weight, labels), atol=2e-2)
    assert jnp.allclose(logits_infer, ref(features, weight, None), atol=2e-2)
    assert not bool(jnp.any(jnp.isnan(logits_train)))

    print("KERNEL_OK")
</pallas_src>

<mosaic_0001>
module attributes {stable_mosaic.version = 11 : i64} {
  func.func @_arcface_train_kernel(%arg0: i32, %arg1: i32, %arg2: memref<16x32xbf16, #tpu.memory_space<vmem>>, %arg3: memref<128x32xbf16, #tpu.memory_space<vmem>>, %arg4: memref<16x1xi32, #tpu.memory_space<vmem>>, %arg5: memref<16x128xf32, #tpu.memory_space<vmem>>) attributes {dimension_semantics = [#tpu.dimension_semantics<parallel>, #tpu.dimension_semantics<parallel>], iteration_bounds = array<i64: 2, 1>, scalar_prefetch = 0 : i64, scratch_operands = 0 : i64, tpu.core_type = #tpu.core_type<tc>, window_params = [{transform_indices = @transform_0, window_bounds = array<i64: 16, 32>}, {transform_indices = @transform_1, window_bounds = array<i64: 128, 32>}, {transform_indices = @transform_2, window_bounds = array<i64: 16, 1>}, {transform_indices = @transform_3, window_bounds = array<i64: 16, 128>}]} {
    %c0 = arith.constant 0 : index
    %c0_0 = arith.constant 0 : index
    %0 = vector.load %arg2[%c0, %c0_0] : memref<16x32xbf16, #tpu.memory_space<vmem>>, vector<16x32xbf16>
    %c0_1 = arith.constant 0 : index
    %c0_2 = arith.constant 0 : index
    %1 = vector.load %arg3[%c0_1, %c0_2] : memref<128x32xbf16, #tpu.memory_space<vmem>>, vector<128x32xbf16>
    %cst = arith.constant dense<0.000000e+00> : vector<16x128xf32>
    %2 = tpu.matmul %0, %1, %cst {dimension_numbers = #tpu.dot_dimension_numbers<[1], [1], [0], [0], [0, 0, 1, 0], [], []>} : vector<16x32xbf16>, vector<128x32xbf16>, vector<16x128xf32> -> vector<16x128xf32>
    %c0_3 = arith.constant 0 : index
    %c0_4 = arith.constant 0 : index
    %3 = vector.load %arg4[%c0_3, %c0_4] : memref<16x1xi32, #tpu.memory_space<vmem>>, vector<16x1xi32>
    %c128_i32 = arith.constant 128 : i32
    %4 = arith.muli %arg0, %c128_i32 : i32
    %5 = tpu.iota {dimensions = array<i32: 1>} : vector<16x128xi32>
    %6 = vector.broadcast %4 : i32 to vector<16x128xi32>
    %7 = arith.addi %6, %5 : vector<16x128xi32>
    %8 = vector.broadcast %3 : vector<16x1xi32> to vector<16x128xi32>
    %9 = arith.cmpi eq, %7, %8 : vector<16x128xi32>
    %cst_5 = arith.constant 0.000000e+00 : f32
    %10 = vector.broadcast %cst_5 : f32 to vector<16x128xf32>
    %11 = arith.select %9, %2, %10 : vector<16x128xi1>, vector<16x128xf32>
    %cst_6 = arith.constant dense<0.000000e+00> : vector<16xf32>
    %12 = vector.multi_reduction <add>, %11, %cst_6 [1] : vector<16x128xf32> to vector<16xf32>
    %13 = vector.shape_cast %12 : vector<16xf32> to vector<16x1xf32>
    %14 = arith.mulf %13, %13 : vector<16x1xf32>
    %cst_7 = arith.constant 1.000000e+00 : f32
    %15 = vector.broadcast %cst_7 : f32 to vector<16x1xf32>
    %16 = arith.subf %15, %14 : vector<16x1xf32>
    %cst_8 = arith.constant 0.000000e+00 : f32
    %17 = vector.broadcast %cst_8 : f32 to vector<16x1xf32>
    %18 = arith.maximumf %16, %17 : vector<16x1xf32>
    %19 = math.sqrt %18 : vector<16x1xf32>
    %cst_9 = arith.constant 0.87758255 : f32
    %20 = vector.broadcast %cst_9 : f32 to vector<16x1xf32>
    %21 = arith.mulf %13, %20 : vector<16x1xf32>
    %cst_10 = arith.constant 0.47942555 : f32
    %22 = vector.broadcast %cst_10 : f32 to vector<16x1xf32>
    %23 = arith.mulf %19, %22 : vector<16x1xf32>
    %24 = arith.subf %21, %23 : vector<16x1xf32>
    %25 = vector.shape_cast %24 : vector<16x1xf32> to vector<16x1xf32>
    %26 = vector.broadcast %25 : vector<16x1xf32> to vector<16x128xf32>
    %27 = arith.select %9, %26, %2 : vector<16x128xi1>, vector<16x128xf32>
    %cst_11 = arith.constant 3.000000e+01 : f32
    %28 = vector.broadcast %cst_11 : f32 to vector<16x128xf32>
    %29 = arith.mulf %27, %28 : vector<16x128xf32>
    %c0_12 = arith.constant 0 : index
    %c0_13 = arith.constant 0 : index
    %30 = vector.load %arg5[%c0_12, %c0_13] : memref<16x128xf32, #tpu.memory_space<vmem>>, vector<16x128xf32>
    tpu.vector_store %arg5[%c0_12, %c0_13], %29 {strides = array<i32>} : memref<16x128xf32, #tpu.memory_space<vmem>>, vector<16x128xf32>,
    return
  }
  func.func @transform_0(%arg0: i32, %arg1: i32) -> (i32, i32) {
    %c0_i32 = arith.constant 0 : i32
    %c0_i32_0 = arith.constant 0 : i32
    return %arg1, %c0_i32 : i32, i32
  }
  func.func @transform_1(%arg0: i32, %arg1: i32) -> (i32, i32) {
    %c0_i32 = arith.constant 0 : i32
    %c0_i32_0 = arith.constant 0 : i32
    return %arg0, %c0_i32 : i32, i32
  }
  func.func @transform_2(%arg0: i32, %arg1: i32) -> (i32, i32) {
    %c0_i32 = arith.constant 0 : i32
    %c0_i32_0 = arith.constant 0 : i32
    return %arg1, %c0_i32 : i32, i32
  }
  func.func @transform_3(%arg0: i32, %arg1: i32) -> (i32, i32) {
    %c0_i32 = arith.constant 0 : i32
    return %arg1, %arg0 : i32, i32
  }
}

</mosaic_0001>

<bundles_post_ra>
// kernel: tpu_custom_call.1
= control target key start
LH: loop header
LB: loop body
LE: loop exit
PB: predicated region body
PF: predicated region fallthrough
CT: control target
= control target key end

     0   :  { %8 = vsyncpa [#allocation3], 0  ;;  %s920_s0 = inlined_call_operand.vmem [shape: bf16[16,32], index: 0, kind: input, shape index: {}]   ;;  %s921_s1 = inlined_call_operand.vmem [shape: bf16[256,32], index: 1, kind: input, shape index: {}]   ;;  %s922_s2 = inlined_call_operand.vmem [shape: s32[16,1], index: 2, kind: input, shape index: {}]   ;;  %s923_s3 = inlined_call_operand.hbm [shape: f32[16,256], index: 3, kind: output, shape index: {}]  }
   0x1   :  { %10 = vsyncpa [#allocation3 + $0x1], 0  ;;  %s770_s12 = smov 0   ;;  %s772_s13 = smov 0  }
   0x2   :  { %s774_s14 = smov 0   ;;  %s776_s15 = smov 0  }
   0x3   :  { %s778_s16 = smov 0   ;;  %s780_s17 = smov 0  }
   0x4 LB: > { %s534_s18 = sadd.s32 4294967295, %s741_s17   ;;  %s535_s19 = sadd.s32 4294967294, %s741_s17   ;;  %s741_s17 = sphi %s780_s17, %s16_s17   ;;  %s737_s16 = sphi %s778_s16, %s930_s16   ;;  %s733_s15 = sphi %s776_s15, %s929_s15   ;;  %s729_s14 = sphi %s774_s14, %s928_s14   ;;  %s725_s13 = sphi %s772_s13, %s927_s13   ;;  %s721_s12 = sphi %s770_s12, %s926_s12  }
   0x5   : > { %s28_s20 = sadd.s32 1, %s737_s16  ;;  %s115_s21 = sadd.s32 1, %s729_s14 }
   0x6   : > { %p30_p0 = scmp.ge.s32.totalorder %s28_s20, 2  ;;  %p125_p1 = scmp.ne.s32.totalorder %s729_s14, %s725_s13 }
   0x7   : > { %p126_p2 = scmp.eq.s32.totalorder %s534_s18, 1  ;;  %p131_p3 = scmp.ne.s32.totalorder %s725_s13, %s721_s12 }
   0x8   : > { %s932_s20 = smov (%p30_p0, %s28_s20), 0  ;;  %p132_p5 = scmp.eq.s32.totalorder %s535_s19, 1 }
   0x9   : > { %p810_p4 = por %p126_p2, %p125_p1  ;;  %s111_s23 = ssub.s32 %s737_s16, %s932_s20 }
   0xa   : > { %p540_p6 = scmp.ge.s32.totalorder %s741_s17, 1  ;;  %p113_p7 = scmp.eq.s32.totalorder %s111_s23, 0 }
   0xb   : > { %p817_p8 = por %p132_p5, %p131_p3  ;;  %p177_p9 = scmp.lt.s32.totalorder %s741_s17, 3 }
   0xc   : > { %s823_s25 = scalar_select %p113_p7, %s729_s14, %s115_s21  }
   0xd   : > { %p178_p10 = pnand %p540_p6, %p177_p9 }
   0xe   : > { %s542_s26 = sshll.u32 (!%p178_p10), %s733_s15, 4  ;;  %v743_v0 = vmov (!%p178_p10), 0.0   ;;  %vm744_vm0 = vmmov (!%p178_p10), 0   ;;  %v363_v1 = vld [vmem:[%s922_s2] sm:$0xff] (!%p178_p10)  ;;  %v745_v2 = vmov (!%p178_p10), 0   ;;  %v364_v3 = vld [vmem:[%s922_s2 + $0x8] sm:$0xff] (!%p178_p10)  ;;  %v366_v21 = vlaneseq (!%p178_p10) }
   0xf   : > { %181 = sbr.rel (%p178_p10) target bundleno = 493 (0x1ed), region = 32  ;;  %568 = vmatprep.subr.bf16.mxu0 (!%p178_p10), %v743_v0  ;;  %p218_p11 = scmp.lt.s32.totalorder (!%p178_p10), %s542_s26, 31  ;;  %584 = vmatprep.mubr.msk.bf16.mxu0 (!%p178_p10), %vm744_vm0, %v743_v0  ;;  %vm294_vm1 = vcmask (!%p178_p10), 261120   ;;  %v658_v20 = vld [vmem:[%s920_s0] sm:$0xff] (!%p178_p10)  }
  0x10   : > { %649 = vset.pattern.permute.xlu0 (!%p178_p10), %v745_v2  ;;  %s554_s10 = sshll.u32 (!%p178_p10), %s733_s15, 7  ;;  %v367_v22 = vand.u32 (!%p178_p10), 127, %v366_v21  ;;  %s208_s11 = sand.u32 (!%p178_p10), 1, %s725_s13  }
  0x11   : > { %371 = vperm.xlu0 (!%p178_p10), %649, %v363_v1   ;;  %v368_v23 = vstv (!%p178_p10), %s554_s10  ;;  %s541_s18 = sshll.u32 (!%p178_p10), %s208_s11, 4  ;;  %s869_s27 = scalar_lea.hbm (!%p178_p10), %s923_s3, %s554_s10 }
  0x12   : > { %v369_v24 = vadd.s32 (!%p178_p10), %v368_v23, %v367_v22  ;;  %s210_s19 = scalar_lea.vmem (!%p178_p10), [#allocation2], %s541_s18  ;;  %s874_s28 = scalar_lea.sflag (!%p178_p10), [#allocation3], %s208_s11 }
  0x13   : > { %s432_s21 = sshll.u32 (!%p178_p10), %s210_s19, 4  ;;  %s746_s15 = smov (!%p178_p10), [#allocation2]   ;;  %s871_s21 = int_to_ptr.vmem [resolvable:$true] %s432_s21 }
  0x14   : > { %s663_s29 = scalar_lea.vmem (!%p178_p10), %s871_s21, 256  ;;  %s667_s30 = sshll.u32 (!%p178_p10), %s746_s15, 4  ;;  %s668_s30 = int_to_ptr.vmem [resolvable:$false] %s667_s30 }
  0x15   : > { %374 = vperm.xlu0 (!%p178_p10), %649, %v364_v3   ;;  %p664_p12 = scmp.ne.s32.totalorder (!%p178_p10), %s871_s21, %s663_s29  ;;  %p670_p1 = scmp.lt.s32.totalorder (!%p178_p10), %s871_s21, %s668_s30 }
  0x16   : > { %s934_s26 = smov (!%p218_p11, %s542_s26), 31 }
  0x17   : > { %s543_s4 = sshll.u32 %s934_s26, 2  ;;  %p665_p13 = pnand %p664_p12, %p810_p4 }
  0x18   : > { %s835_s7 = scalar_lea.vmem %s921_s1, %s543_s4  ;;  %s669_s4 = scalar_lea.vmem %s668_s30, 512 }
  0x19   : > { %v650_v4 = vld [vmem:[%s835_s7] sm:$0xff]   ;;  %v651_v6 = vld [vmem:[%s835_s7 + $0x8] sm:$0xff]   ;;  %v652_v8 = vld [vmem:[%s835_s7 + $0x10] sm:$0xff]   ;;  %p666_p0 = pneg %p665_p13  ;;  %p671_p2 = scmp.lt.s32.totalorder %s669_s4, %s663_s29 }
  0x1a   : > { %v299_v5 = vsel %vm294_vm1, %v650_v4, 0  ;;  %v302_v7 = vsel %vm294_vm1, %v651_v6, 0  ;;  %v305_v9 = vsel %vm294_vm1, %v652_v8, 0  ;;  %v653_v10 = vld [vmem:[%s835_s7 + $0x18] sm:$0xff]   ;;  %v654_v12 = vld [vmem:[%s835_s7 + $0x20] sm:$0xff]   ;;  %v655_v14 = vld [vmem:[%s835_s7 + $0x28] sm:$0xff]  }
  0x1b   : > { %569 = vmatpush3.bf16.xpose.msra.mxu0 %v299_v5  ;;  %v308_v11 = vsel %vm294_vm1, %v653_v10, 0  ;;  %v311_v13 = vsel %vm294_vm1, %v654_v12, 0  ;;  %v314_v15 = vsel %vm294_vm1, %v655_v14, 0  ;;  %v656_v16 = vld [vmem:[%s835_s7 + $0x30] sm:$0xff]   ;;  %v657_v18 = vld [vmem:[%s835_s7 + $0x38] sm:$0xff]   ;;  %p672_p3 = por %p671_p2, %p670_p1 }
  0x1c   : > { %570 = vmatprep.subr.bf16.mxu0 %v743_v0  ;;  %v317_v17 = vsel %vm294_vm1, %v656_v16, 0  ;;  %v320_v19 = vsel %vm294_vm1, %v657_v18, 0 }
  0x1d   : > { %p673_p5 = pnand %p672_p3, %p666_p0 }
  0x23   : > { %571 = vmatpush3.bf16.xpose.msra.mxu0 %v302_v7 }
  0x24   : > { %572 = vmatprep.subr.bf16.mxu0 %v743_v0 }
  0x2b   : > { %573 = vmatpush3.bf16.xpose.msra.mxu0 %v305_v9 }
  0x2c   : > { %574 = vmatprep.subr.bf16.mxu0 %v743_v0 }
  0x33   : > { %575 = vmatpush3.bf16.xpose.msra.mxu0 %v308_v11 }
  0x34   : > { %576 = vmatprep.subr.bf16.mxu0 %v743_v0 }
  0x3b   : > { %577 = vmatpush3.bf16.xpose.msra.mxu0 %v311_v13 }
  0x3c   : > { %578 = vmatprep.subr.bf16.mxu0 %v743_v0 }
  0x43   : > { %579 = vmatpush3.bf16.xpose.msra.mxu0 %v314_v15 }
  0x44   : > { %580 = vmatprep.subr.bf16.mxu0 %v743_v0 }
  0x4b   : > { %581 = vmatpush3.bf16.xpose.msra.mxu0 %v317_v17 }
  0x4c   : > { %582 = vmatprep.subr.bf16.mxu0 %v743_v0 }
  0x53   : > { %583 = vmatpush3.bf16.xpose.msra.mxu0 %v320_v19 }
  0x5a   : > { %585 = vmatmul.mubr.msk.bf16.vlgmr.msra.gmra.mrb[0].mxu0 %vm294_vm1, %v658_v20 }
  0x90   : > { %v372_v25 = vpop.permute.xlu0 %371 }
  0x91   : > { %vm376_vm2 = vcmp.eq.s32.totalorder %v369_v24, %v372_v25 }
  0x94   : > { %v375_v27 = vpop.permute.xlu0 %374 }
  0x95   : > { %vm377_vm3 = vcmp.eq.s32.totalorder %v369_v24, %v375_v27 }
 0x12d   : > { %v356_v26 = vpop.f32.mrb[0].mxu0 }
 0x12e   : > { %v586_v28 = vpop.f32.mrb[1].mxu0  ;;  %v378_v29 = vsel %vm376_vm2, %v356_v26, 0.0 }
 0x12f   : > { %380 = vadd.xlane.f32.xlu1 %v378_v29  ;;  %v359_v30 = vpop.f32.mrb[2].mxu0 }
 0x130   : > { %v587_v31 = vpop.f32.mrb[3].mxu0  ;;  %v379_v32 = vsel %vm377_vm3, %v359_v30, 0.0 }
 0x133   : > { %382 = vadd.xlane.f32.xlu1 %v379_v32 }
 0x1bc   : > { %v381_v33 = vpop.xlane.xlu1 %380 }
 0x1bd   : > { %v384_v34 = vmul.f32 %v381_v33, %v381_v33  ;;  %v404_v47 = vmul.f32 0.87758255, %v381_v33 }
 0x1bf   : > { %v386_v35 = vsub.f32 1.0, %v384_v34 }
 0x1c0   : > { %v383_v36 = vpop.xlane.xlu1 %382 }
 0x1c1   : > { %v388_v37 = vmax.f32 %v386_v35, 0.0  ;;  %v385_v38 = vmul.f32 %v383_v36, %v383_v36  ;;  %v405_v56 = vmul.f32 0.87758255, %v383_v36 }
 0x1c3   : > { %659 = vrsqrt.f32 %v388_v37  ;;  %v387_v39 = vsub.f32 1.0, %v385_v38  ;;  %vm392_vm4 = vcmp.eq.f32.partialorder %v388_v37, inf  ;;  %v395_v43 = vand.u32 2147483648, %v388_v37 }
 0x1c4   : > { %vm394_vm5 = vcmp.eq.f32.partialorder %v388_v37, 0.0 }
 0x1c5   : > { %v389_v40 = vmax.f32 %v387_v39, 0.0 }
 0x1c7   : > { %661 = vrsqrt.f32 %v389_v40  ;;  %vm399_vm6 = vcmp.eq.f32.partialorder %v389_v40, inf  ;;  %v402_v51 = vand.u32 2147483648, %v389_v40  ;;  %vm401_vm7 = vcmp.eq.f32.partialorder %v389_v40, 0.0 }
 0x1cd   : > { %v660_v41 = vpop.eup %659 }
 0x1ce   : > { %v391_v42 = vmul.f32 %v660_v41, %v388_v37 }
 0x1d0   : > { %v393_v44 = vsel %vm392_vm4, %v388_v37, %v391_v42 }
 0x1d1   : > { %v396_v45 = vsel %vm394_vm5, %v395_v43, %v393_v44  ;;  %v662_v46 = vpop.eup %661 }
 0x1d2   : > { %v406_v48 = vmul.f32 0.47942555, %v396_v45  ;;  %v398_v49 = vmul.f32 %v662_v46, %v389_v40 }
 0x1d4   : > { %v408_v50 = vsub.f32 %v404_v47, %v406_v48  ;;  %v400_v52 = vsel %vm399_vm6, %v389_v40, %v398_v49 }
 0x1d5   : > { %v403_v54 = vsel %vm401_vm7, %v402_v51, %v400_v52 }
 0x1d6   : > { %v410_v53 = vsel %vm376_vm2, %v408_v50, %v356_v26  ;;  %v407_v57 = vmul.f32 0.47942555, %v403_v54 }
 0x1d7   : > { %v412_v55 = vmul.f32 30.0, %v410_v53 }
 0x1d8   : > { %v409_v58 = vsub.f32 %v405_v56, %v407_v57 }
 0x1d9   : > { %414 = vst [vmem:[%s210_s19] sm:$0xff] %v412_v55 }
 0x1da   : > { %v411_v59 = vsel %vm377_vm3, %v409_v58, %v359_v30 }
 0x1db   : > { %v413_v60 = vmul.f32 30.0, %v411_v59 }
 0x1dd   : > { %415 = vst [vmem:[%s210_s19 + $0x8] sm:$0xff] %v413_v60 }
 0x1de   : > { %676 = shalt.err (!%p673_p5)
}
 0x1df   : > { %s677_s5 = scalar_lea.hbm %s869_s27, 256  ;;  %s681_s8 = scalar_lea.hbm %s923_s3, 512 }
 0x1e0   : > { %p678_p6 = scmp.ne.s32.totalorder %s869_s27, %s677_s5  ;;  %p682_p10 = scmp.lt.u32.totalorder %s869_s27, %s923_s3 }
 0x1e1   : > { %p683_p11 = scmp.lt.u32.totalorder %s681_s8, %s677_s5  ;;  %p685_p13 = scmp.lt.u32.totalorder %s677_s5, %s869_s27 }
 0x1e2   : > { %p679_p7 = pnand %p678_p6, %p810_p4 }
 0x1e3   : > { %p684_p12 = por %p683_p11, %p682_p10 }
 0x1e4   : > { %p680_p9 = pneg %p679_p7 }
 0x1e5   : > { %p686_p0 = por %p685_p13, %p684_p12 }
 0x1e7   : > { %p687_p1 = pnand %p686_p0, %p680_p9 }
 0x1e9   : > { %690 = shalt.err (!%p687_p1)
}
 0x1ea   : > { %s747_s11 = smov 128   ;;  %s748_s18 = smov 256  }
 0x1eb   : > { %s749_s19 = smov 8  }
 0x1ec   : > { %588 = dma.vmem_to_hbm [thread:$0]  (%p810_p4), %s871_s21, 256, %s869_s27, %s874_s28, %s747_s11, %s748_s18, %s749_s19  }
 0x1ed PF: > { %p594_p2 = scmp.ge.s32.totalorder %s741_s17, 2  ;;  %s447_s23 = sand.u32 1, %s721_s12  }
 0x1ee   : > { %s448_s26 = scalar_lea.sflag [#allocation3], %s447_s23 }
 0x1ef   : > { %p591_p3 = pnand %p594_p2, %p817_p8 }
 0x1f1   : > { %716 = dma.done.wait (!%p591_p3), %s448_s26, 256  }
 0x1f2   : > { %718 = vsyncadd (!%p591_p3), %s448_s26, 4294967040  ;;  %s16_s17 = sadd.s32 1, %s741_s17   ;;  %s926_s12 = smov %s725_s13 }
 0x1f3   : > { %p13_p5 = scmp.ge.s32.totalorder %s16_s17, 4   ;;  %s927_s13 = smov %s729_s14 }
 0x1f4   : > { %s928_s14 = smov %s823_s25  ;;  %s929_s15 = smov %s737_s16 }
 0x1f5   : > { %s930_s16 = smov %s932_s20  ;;  %15 = sbr.rel (!%p13_p5) target bundleno = 4 (0x4), region = 73 }
 0x1fc   :  { %453 = vsyncpa [#allocation3], 1 }
 0x1fd   :  { %455 = vsyncpa [#allocation3 + $0x1], 1 }

</bundles_post_ra>
